<compile_context>
chip_gen: v7x
topology: tpu7x:2x2x1
jax: 0.10.0
libtpu: 0.0.40
codegen_flags: <defaults>
</compile_context>

<pallas_src>
import functools

import jax
import jax.numpy as jnp
from jax.experimental import pallas as pl
from jax.experimental.pallas import tpu as pltpu

EMB = 128        # embedding_size
HID = 128        # hidden width
OUT = 6          # number of actions
OUT_PAD = 128    # lane-dense padded logit/output width
N_LAYERS = 5
NEG_BIG = -1e30  # bias for padded logit lanes -> exp() underflows to exactly 0
ROW_ALIGN = 16   # bf16 sublane packing: keep row tiles multiples of 16


def _mlp_softmax_kernel(x_ref, w_ref, b_ref, o_ref):
    """Fused 5-layer MLP + softmax over one (TM, 128) row tile.

    x_ref : (TM, 128)  bf16 input rows
    w_ref : (128, 640) bf16 weights, all 5 layers concatenated on the lane
            axis ((in, out) layout, transposed vs torch); layer 5 is
            zero-padded from 6 to 128 output columns.
    b_ref : (1, 640)   f32 biases concatenated likewise; layer-5 pad lanes
            carry -1e30 (kept in f32 so they never become -inf).
    o_ref : (TM, 128)  bf16 softmax probabilities (lanes [6:] are 0).
    """
    h = x_ref[...]                                       # bf16 (TM, 128)

    def layer(h_bf16, k):
        w = w_ref[:, pl.ds(k * HID, HID)]                # static, zero-cost views
        b = b_ref[:, pl.ds(k * HID, HID)]
        acc = jnp.dot(h_bf16, w, preferred_element_type=jnp.float32)
        return acc + b                                   # f32 (TM, 128)

    for k in range(N_LAYERS - 1):
        h = jnp.maximum(layer(h, k), 0.0).astype(jnp.bfloat16)
    logits = layer(h, N_LAYERS - 1)                      # pad lanes ~ -1e30

    # Softmax over the (padded) action axis; pad lanes contribute exactly 0.
    m = jnp.max(logits, axis=-1, keepdims=True)
    e = jnp.exp(logits - m)
    denom = jnp.sum(e, axis=-1, keepdims=True)
    o_ref[...] = (e * pl.reciprocal(denom, approx=True)).astype(o_ref.dtype)


def prepare_params(params):
    """One-time parameter prep (call once, reuse every forward call).

    Casts weights to bf16, pads layer 5 to 128 output lanes, and concatenates
    all layers along the lane axis so the kernel takes only two resident
    operands.  Biases stay f32 (pad lanes must stay -1e30, not -inf).
    """
    (w1, b1), (w2, b2), (w3, b3), (w4, b4), (w5, b5) = params
    w5p = jnp.zeros((HID, OUT_PAD), jnp.float32).at[:, :OUT].set(w5)
    b5p = jnp.full((1, OUT_PAD), NEG_BIG, jnp.float32).at[:, :OUT].set(
        jnp.reshape(b5, (1, OUT)))
    w_cat = jnp.concatenate([w1, w2, w3, w4, w5p], axis=1).astype(jnp.bfloat16)
    b_cat = jnp.concatenate(
        [jnp.reshape(b, (1, -1)).astype(jnp.float32)
         for b in (b1, b2, b3, b4, b5p)], axis=1)
    return jax.device_put(w_cat), jax.device_put(b_cat)


def _round_up(n, m):
    return ((n + m - 1) // m) * m


@functools.partial(jax.jit, static_argnames=("tm",))
def pommer_q_embedding_mlp_forward(x_board, w_cat, b_cat, *, tm=1024):
    """Equivalent of PommerQEmbeddingMLP.forward([x_board]).

    x_board       : (B, S, 128) board embeddings (any float dtype)
    w_cat, b_cat  : output of prepare_params(...)
    returns       : softmax(5-layer MLP(x_board)).squeeze()
    """
    B, S, E = x_board.shape
    assert E == EMB
    M = B * S
    # bf16 activation stream (the cast fuses with the reshape under jit).
    x2d = x_board.reshape(M, E).astype(jnp.bfloat16)

    # Row tile: multiple of 16, capped at `tm`, and capped at ~M/2 so M >= 32
    # gives >= 2 grid steps (lets the "parallel" axis shard across both v7x
    # TensorCores).  No input padding: ceil-divided grid, ragged last block
    # is masked by Pallas and its rows are sliced off below.
    tm = _round_up(tm, ROW_ALIGN)
    TM = max(ROW_ALIGN,
             min(tm, _round_up(M, ROW_ALIGN), _round_up(pl.cdiv(M, 2), ROW_ALIGN)))
    grid = (pl.cdiv(M, TM),)

    row_spec = lambda w: pl.BlockSpec((TM, w), lambda i: (i, 0))
    # Constant block index -> weights/biases are DMA'd once and stay
    # VMEM-resident across all grid steps.
    fixed_spec = lambda shape: pl.BlockSpec(shape, lambda i: (0, 0))

    rows = grid[0] * TM
    flops = 2 * rows * N_LAYERS * HID * HID
    bytes_accessed = (M * EMB * 2 + M * OUT_PAD * 2
                      + int(w_cat.size) * 2 + int(b_cat.size) * 4)

    out2d = pl.pallas_call(
        _mlp_softmax_kernel,
        out_shape=jax.ShapeDtypeStruct((M, OUT_PAD), jnp.bfloat16),
        grid=grid,
        in_specs=[row_spec(EMB),
                  fixed_spec(w_cat.shape),
                  fixed_spec(b_cat.shape)],
        out_specs=row_spec(OUT_PAD),
        compiler_params=pltpu.CompilerParams(
            dimension_semantics=("parallel",),   # megacore-shardable on v7x
        ),
        cost_estimate=pl.CostEstimate(
            flops=flops,
            transcendentals=rows * OUT_PAD,
            bytes_accessed=bytes_accessed,
        ),
    )(x2d, w_cat, b_cat)

    out = out2d[:, :OUT].astype(jnp.float32).reshape(B, S, OUT)
    # torch .squeeze(): drop all singleton dims
    return jnp.squeeze(out)


def init_params(key):
    """Deterministic init mimicking torch.nn.Linear default (U[-1/sqrt(fan_in), +])."""
    dims = [(EMB, HID), (HID, HID), (HID, HID), (HID, HID), (HID, OUT)]
    params = []
    for i, (fan_in, fan_out) in enumerate(dims):
        kw, kb = jax.random.split(jax.random.fold_in(key, i))
        bound = 1.0 / jnp.sqrt(float(fan_in))
        # weights stored as (in, out) so the kernel does x @ w directly
        w = jax.random.uniform(kw, (fan_in, fan_out), jnp.float32, -bound, bound)
        b = jax.random.uniform(kb, (1, fan_out), jnp.float32, -bound, bound)
        params.append((w, b))
    return params


def _reference_forward(x_board, params):
    """Pure-JAX f32 reference of the torch module's forward."""
    (w1, b1), (w2, b2), (w3, b3), (w4, b4), (w5, b5) = params
    h = x_board
    for w, b in ((w1, b1), (w2, b2), (w3, b3), (w4, b4)):
        h = jnp.maximum(h @ w + b, 0.0)
    logits = h @ w5 + b5
    return jnp.squeeze(jax.nn.softmax(logits, axis=-1))


if __name__ == "__main__":
    key = jax.random.PRNGKey(0)
    k_x, k_p = jax.random.split(key)

    B, S = 2, 8
    # obs[0] == x_board: the precomputed board embedding, shape (B, S, 128)
    # TODO(synk): the frozen embedding_model is only used in get_transformer(),
    # not in forward(), so it is not part of this kernel.
    x_board = jax.random.normal(k_x, (B, S, EMB), dtype=jnp.float32)
    params = init_params(k_p)

    # One-time parameter prep, hoisted out of the per-call path.
    w_cat, b_cat = prepare_params(params)

    out = jax.block_until_ready(
        pommer_q_embedding_mlp_forward(x_board, w_cat, b_cat))

    # sanity: shape, softmax rows sum to ~1 (approx reciprocal + bf16 streams),
    # and agreement with the f32 reference.
    assert out.shape == (B, S, OUT), out.shape
    row_sums = jnp.sum(out, axis=-1)
    assert jnp.allclose(row_sums, 1.0, atol=2.5e-2), row_sums
    ref = _reference_forward(x_board, params)
    assert jnp.allclose(out, ref, atol=4e-2), float(jnp.max(jnp.abs(out - ref)))

    print("KERNEL_OK")
</pallas_src>

<mosaic_0001>
module attributes {stable_mosaic.version = 11 : i64} {
  func.func @_mlp_softmax_kernel(%arg0: i32, %arg1: memref<16x128xbf16, #tpu.memory_space<vmem>>, %arg2: memref<128x640xbf16, #tpu.memory_space<vmem>>, %arg3: memref<1x640xf32, #tpu.memory_space<vmem>>, %arg4: memref<16x128xbf16, #tpu.memory_space<vmem>>) attributes {dimension_semantics = [#tpu.dimension_semantics<parallel>], iteration_bounds = array<i64: 1>, scalar_prefetch = 0 : i64, scratch_operands = 0 : i64, tpu.core_type = #tpu.core_type<tc>, window_params = [{transform_indices = @transform_0, window_bounds = array<i64: 16, 128>}, {pipeline_mode = #tpu.pipeline_mode<synchronous>, transform_indices = @transform_1, window_bounds = array<i64: 128, 640>}, {pipeline_mode = #tpu.pipeline_mode<synchronous>, transform_indices = @transform_2, window_bounds = array<i64: 1, 640>}, {transform_indices = @transform_3, window_bounds = array<i64: 16, 128>}]} {
    %c0 = arith.constant 0 : index
    %c0_0 = arith.constant 0 : index
    %0 = vector.load %arg1[%c0, %c0_0] : memref<16x128xbf16, #tpu.memory_space<vmem>>, vector<16x128xbf16>
    %c0_1 = arith.constant 0 : index
    %c0_2 = arith.constant 0 : index
    %1 = vector.load %arg2[%c0_1, %c0_2] : memref<128x640xbf16, #tpu.memory_space<vmem>>, vector<128x128xbf16>
    %c0_3 = arith.constant 0 : index
    %c0_4 = arith.constant 0 : index
    %2 = vector.load %arg3[%c0_3, %c0_4] : memref<1x640xf32, #tpu.memory_space<vmem>>, vector<1x128xf32>
    %cst = arith.constant dense<0.000000e+00> : vector<16x128xf32>
    %3 = tpu.matmul %0, %1, %cst {dimension_numbers = #tpu.dot_dimension_numbers<[1], [0], [0], [1], [0, 0, 1, 1], [], []>} : vector<16x128xbf16>, vector<128x128xbf16>, vector<16x128xf32> -> vector<16x128xf32>
    %4 = vector.broadcast %2 : vector<1x128xf32> to vector<16x128xf32>
    %5 = arith.addf %3, %4 : vector<16x128xf32>
    %cst_5 = arith.constant 0.000000e+00 : f32
    %6 = vector.broadcast %cst_5 : f32 to vector<16x128xf32>
    %7 = arith.maximumf %5, %6 : vector<16x128xf32>
    %8 = arith.truncf %7 : vector<16x128xf32> to vector<16x128xbf16>
    %c0_6 = arith.constant 0 : index
    %c128 = arith.constant 128 : index
    %9 = vector.load %arg2[%c0_6, %c128] : memref<128x640xbf16, #tpu.memory_space<vmem>>, vector<128x128xbf16>
    %c0_7 = arith.constant 0 : index
    %c128_8 = arith.constant 128 : index
    %10 = vector.load %arg3[%c0_7, %c128_8] : memref<1x640xf32, #tpu.memory_space<vmem>>, vector<1x128xf32>
    %cst_9 = arith.constant dense<0.000000e+00> : vector<16x128xf32>
    %11 = tpu.matmul %8, %9, %cst_9 {dimension_numbers = #tpu.dot_dimension_numbers<[1], [0], [0], [1], [0, 0, 1, 1], [], []>} : vector<16x128xbf16>, vector<128x128xbf16>, vector<16x128xf32> -> vector<16x128xf32>
    %12 = vector.broadcast %10 : vector<1x128xf32> to vector<16x128xf32>
    %13 = arith.addf %11, %12 : vector<16x128xf32>
    %cst_10 = arith.constant 0.000000e+00 : f32
    %14 = vector.broadcast %cst_10 : f32 to vector<16x128xf32>
    %15 = arith.maximumf %13, %14 : vector<16x128xf32>
    %16 = arith.truncf %15 : vector<16x128xf32> to vector<16x128xbf16>
    %c0_11 = arith.constant 0 : index
    %c256 = arith.constant 256 : index
    %17 = vector.load %arg2[%c0_11, %c256] : memref<128x640xbf16, #tpu.memory_space<vmem>>, vector<128x128xbf16>
    %c0_12 = arith.constant 0 : index
    %c256_13 = arith.constant 256 : index
    %18 = vector.load %arg3[%c0_12, %c256_13] : memref<1x640xf32, #tpu.memory_space<vmem>>, vector<1x128xf32>
    %cst_14 = arith.constant dense<0.000000e+00> : vector<16x128xf32>
    %19 = tpu.matmul %16, %17, %cst_14 {dimension_numbers = #tpu.dot_dimension_numbers<[1], [0], [0], [1], [0, 0, 1, 1], [], []>} : vector<16x128xbf16>, vector<128x128xbf16>, vector<16x128xf32> -> vector<16x128xf32>
    %20 = vector.broadcast %18 : vector<1x128xf32> to vector<16x128xf32>
    %21 = arith.addf %19, %20 : vector<16x128xf32>
    %cst_15 = arith.constant 0.000000e+00 : f32
    %22 = vector.broadcast %cst_15 : f32 to vector<16x128xf32>
    %23 = arith.maximumf %21, %22 : vector<16x128xf32>
    %24 = arith.truncf %23 : vector<16x128xf32> to vector<16x128xbf16>
    %c0_16 = arith.constant 0 : index
    %c384 = arith.constant 384 : index
    %25 = vector.load %arg2[%c0_16, %c384] : memref<128x640xbf16, #tpu.memory_space<vmem>>, vector<128x128xbf16>
    %c0_17 = arith.constant 0 : index
    %c384_18 = arith.constant 384 : index
    %26 = vector.load %arg3[%c0_17, %c384_18] : memref<1x640xf32, #tpu.memory_space<vmem>>, vector<1x128xf32>
    %cst_19 = arith.constant dense<0.000000e+00> : vector<16x128xf32>
    %27 = tpu.matmul %24, %25, %cst_19 {dimension_numbers = #tpu.dot_dimension_numbers<[1], [0], [0], [1], [0, 0, 1, 1], [], []>} : vector<16x128xbf16>, vector<128x128xbf16>, vector<16x128xf32> -> vector<16x128xf32>
    %28 = vector.broadcast %26 : vector<1x128xf32> to vector<16x128xf32>
    %29 = arith.addf %27, %28 : vector<16x128xf32>
    %cst_20 = arith.constant 0.000000e+00 : f32
    %30 = vector.broadcast %cst_20 : f32 to vector<16x128xf32>
    %31 = arith.maximumf %29, %30 : vector<16x128xf32>
    %32 = arith.truncf %31 : vector<16x128xf32> to vector<16x128xbf16>
    %c0_21 = arith.constant 0 : index
    %c512 = arith.constant 512 : index
    %33 = vector.load %arg2[%c0_21, %c512] : memref<128x640xbf16, #tpu.memory_space<vmem>>, vector<128x128xbf16>
    %c0_22 = arith.constant 0 : index
    %c512_23 = arith.constant 512 : index
    %34 = vector.load %arg3[%c0_22, %c512_23] : memref<1x640xf32, #tpu.memory_space<vmem>>, vector<1x128xf32>
    %cst_24 = arith.constant dense<0.000000e+00> : vector<16x128xf32>
    %35 = tpu.matmul %32, %33, %cst_24 {dimension_numbers = #tpu.dot_dimension_numbers<[1], [0], [0], [1], [0, 0, 1, 1], [], []>} : vector<16x128xbf16>, vector<128x128xbf16>, vector<16x128xf32> -> vector<16x128xf32>
    %36 = vector.broadcast %34 : vector<1x128xf32> to vector<16x128xf32>
    %37 = arith.addf %35, %36 : vector<16x128xf32>
    %cst_25 = arith.constant dense<0xFF800000> : vector<16xf32>
    %38 = vector.multi_reduction <maximumf>, %37, %cst_25 [1] : vector<16x128xf32> to vector<16xf32>
    %39 = vector.shape_cast %38 : vector<16xf32> to vector<16x1xf32>
    %40 = vector.broadcast %39 : vector<16x1xf32> to vector<16x128xf32>
    %41 = arith.subf %37, %40 : vector<16x128xf32>
    %42 = math.exp %41 : vector<16x128xf32>
    %cst_26 = arith.constant dense<0.000000e+00> : vector<16xf32>
    %43 = vector.multi_reduction <add>, %42, %cst_26 [1] : vector<16x128xf32> to vector<16xf32>
    %44 = vector.shape_cast %43 : vector<16xf32> to vector<16x1xf32>
    %45 = tpu.reciprocal %44 {approx = true} : vector<16x1xf32> -> vector<16x1xf32>
    %46 = vector.broadcast %45 : vector<16x1xf32> to vector<16x128xf32>
    %47 = arith.mulf %42, %46 : vector<16x128xf32>
    %48 = arith.truncf %47 : vector<16x128xf32> to vector<16x128xbf16>
    %c0_27 = arith.constant 0 : index
    %c0_28 = arith.constant 0 : index
    %49 = vector.load %arg4[%c0_27, %c0_28] : memref<16x128xbf16, #tpu.memory_space<vmem>>, vector<16x128xbf16>
    tpu.vector_store %arg4[%c0_27, %c0_28], %48 {strides = array<i32>} : memref<16x128xbf16, #tpu.memory_space<vmem>>, vector<16x128xbf16>,
    return
  }
  func.func @transform_0(%arg0: i32) -> (i32, i32) {
    %c0_i32 = arith.constant 0 : i32
    %c0_i32_0 = arith.constant 0 : i32
    return %arg0, %c0_i32 : i32, i32
  }
  func.func @transform_1(%arg0: i32) -> (i32, i32) {
    %c0_i32 = arith.constant 0 : i32
    %c0_i32_0 = arith.constant 0 : i32
    %c0_i32_1 = arith.constant 0 : i32
    return %c0_i32, %c0_i32_0 : i32, i32
  }
  func.func @transform_2(%arg0: i32) -> (i32, i32) {
    %c0_i32 = arith.constant 0 : i32
    %c0_i32_0 = arith.constant 0 : i32
    %c0_i32_1 = arith.constant 0 : i32
    return %c0_i32, %c0_i32_0 : i32, i32
  }
  func.func @transform_3(%arg0: i32) -> (i32, i32) {
    %c0_i32 = arith.constant 0 : i32
    %c0_i32_0 = arith.constant 0 : i32
    return %arg0, %c0_i32 : i32, i32
  }
}

</mosaic_0001>

<bundles_post_ra>
// kernel: pommer_q_embedding_mlp_forward.1
= control target key start
LH: loop header
LB: loop body
LE: loop exit
PB: predicated region body
PF: predicated region fallthrough
CT: control target
= control target key end

     0   :  { %8 = vsyncpa [#allocation3], 0  ;;  %s920_s12 = smov [#allocation2]   ;;  %s1028_s0 = inlined_call_operand.vmem [shape: bf16[16,128], index: 0, kind: input, shape index: {}]   ;;  %s1029_s1 = inlined_call_operand.hbm [shape: bf16[128,640], index: 1, kind: input, shape index: {}]   ;;  %s1030_s2 = inlined_call_operand.vmem [shape: f32[1,640], index: 2, kind: input, shape index: {}]   ;;  %s1031_s3 = inlined_call_operand.vmem [shape: bf16[16,128], index: 3, kind: output, shape index: {}]  }
   0x1   :  { %s16_s13 = sshll.u32 %s920_s12, 4  ;;  %s896_s16 = scalar_lea.hbm %s1029_s1, 5120  ;;  %s17_s13 = int_to_ptr.vmem [resolvable:$true] %s16_s13 }
   0x2   :  { %p897_p0 = scmp.ne.s32.totalorder %s1029_s1, %s896_s16  ;;  %p900_p1 = scmp.lt.u32.totalorder %s896_s16, %s1029_s1 }
   0x4   :  { %p902_p2 = pnand %p900_p1, %p897_p0 }
   0x6   :  { %905 = shalt.err (!%p902_p2)
}
   0x7   :  { %s906_s21 = scalar_lea.vmem %s17_s13, 5120  ;;  %p911_p4 = scmp.lt.s32.totalorder %s17_s13, %s17_s13 }
   0x8   :  { %p907_p3 = scmp.ne.s32.totalorder %s17_s13, %s906_s21  ;;  %p912_p5 = scmp.lt.s32.totalorder %s906_s21, %s906_s21 }
   0xa   :  { %p913_p6 = por %p912_p5, %p911_p4 }
   0xc   :  { %p914_p7 = pnand %p913_p6, %p907_p3 }
   0xe   :  { %917 = shalt.err (!%p914_p7)
}
   0xf   :  { %s921_s22 = smov 320   ;;  %s922_s23 = smov 20  }
  0x10   :  { %22 = dma.hbm_to_vmem [thread:$0]  %s1029_s1, 5120, %s17_s13, [#allocation3], %s921_s22, %s921_s22, %s922_s23  }
  0x11   :  { %918 = dma.done.wait [#allocation3], 5120  }
  0x12   :  { %919 = vsyncadd [#allocation3], 4294962176  ;;  %v923_v0 = vmov 0.0   ;;  %vm924_vm0 = vmmov 0   ;;  %v847_v1 = vld [vmem:[#allocation2] ss:$20 sps:$4 sm:$0xff]  }
  0x13   :  { %742 = vmatprep.subr.bf16.mxu0 %v923_v0  ;;  %758 = vmatprep.mubr.msk.bf16.mxu0 %vm924_vm0, %v923_v0  ;;  %v848_v2 = vld [vmem:[#allocation2 + $0x28] ss:$20 sps:$4 sm:$0xff]   ;;  %v849_v3 = vld [vmem:[#allocation2 + $0x50] ss:$20 sps:$4 sm:$0xff]   ;;  %v850_v5 = vld [vmem:[#allocation2 + $0x78] ss:$20 sps:$4 sm:$0xff]  }
  0x14   :  { %762 = vmatprep.subr.bf16.mxu1 %v923_v0  ;;  %778 = vmatprep.mubr.msk.bf16.mxu1 %vm924_vm0, %v923_v0  ;;  %v856_v4 = vld [vmem:[#allocation2 + $0x4] ss:$20 sps:$4 sm:$0xff]   ;;  %v857_v6 = vld [vmem:[#allocation2 + $0x2c] ss:$20 sps:$4 sm:$0xff]   ;;  %v858_v8 = vld [vmem:[#allocation2 + $0x54] ss:$20 sps:$4 sm:$0xff]  }
  0x15   :  { %743 = vmatpush3.bf16.msra.mxu0 %v847_v1  ;;  %763 = vmatpush3.bf16.msra.mxu1 %v856_v4  ;;  %v851_v7 = vld [vmem:[#allocation2 + $0xa0] ss:$20 sps:$4 sm:$0xff]   ;;  %v852_v9 = vld [vmem:[#allocation2 + $0xc8] ss:$20 sps:$4 sm:$0xff]   ;;  %v853_v11 = vld [vmem:[#allocation2 + $0xf0] ss:$20 sps:$4 sm:$0xff]  }
  0x16   :  { %744 = vmatprep.subr.bf16.mxu0 %v923_v0  ;;  %764 = vmatprep.subr.bf16.mxu1 %v923_v0  ;;  %v859_v10 = vld [vmem:[#allocation2 + $0x7c] ss:$20 sps:$4 sm:$0xff]   ;;  %v860_v12 = vld [vmem:[#allocation2 + $0xa4] ss:$20 sps:$4 sm:$0xff]   ;;  %v861_v14 = vld [vmem:[#allocation2 + $0xcc] ss:$20 sps:$4 sm:$0xff]  }
  0x17   :  { %v854_v13 = vld [vmem:[#allocation2 + $0x118] ss:$20 sps:$4 sm:$0xff]   ;;  %v855_v15 = vld [vmem:[%s1028_s0] sm:$0xff]   ;;  %v862_v16 = vld [vmem:[#allocation2 + $0xf4] ss:$20 sps:$4 sm:$0xff]  }
  0x18   :  { %v863_v17 = vld [vmem:[#allocation2 + $0x11c] ss:$20 sps:$4 sm:$0xff]   ;;  %v866_v20 = vld [vmem:[#allocation2 + $0x58] ss:$20 sps:$4 sm:$0xff]   ;;  %v867_v21 = vld [vmem:[#allocation2 + $0x80] ss:$20 sps:$4 sm:$0xff]  }
  0x19   :  { %745 = vmatpush3.bf16.msra.mxu0 %v848_v2  ;;  %765 = vmatpush3.bf16.msra.mxu1 %v857_v6  ;;  %v864_v18 = vld [vmem:[#allocation2 + $0x8] ss:$20 sps:$4 sm:$0xff]   ;;  %v865_v19 = vld [vmem:[#allocation2 + $0x30] ss:$20 sps:$4 sm:$0xff]   ;;  %v642_v24 = vld [vmem:[%s1030_s2] ss:$0 sm:$0xff] }
  0x1a   :  { %746 = vmatprep.subr.bf16.mxu0 %v923_v0  ;;  %766 = vmatprep.subr.bf16.mxu1 %v923_v0  ;;  %v868_v22 = vld [vmem:[#allocation2 + $0xa8] ss:$20 sps:$4 sm:$0xff]   ;;  %v869_v23 = vld [vmem:[#allocation2 + $0xd0] ss:$20 sps:$4 sm:$0xff]   ;;  %v870_v34 = vld [vmem:[#allocation2 + $0xf8] ss:$20 sps:$4 sm:$0xff]  }
  0x1b   :  { %v871_v35 = vld [vmem:[#allocation2 + $0x120] ss:$20 sps:$4 sm:$0xff]   ;;  %v874_v38 = vld [vmem:[#allocation2 + $0x5c] ss:$20 sps:$4 sm:$0xff]   ;;  %v875_v39 = vld [vmem:[#allocation2 + $0x84] ss:$20 sps:$4 sm:$0xff]  }
  0x1c   :  { %v872_v36 = vld [vmem:[#allocation2 + $0xc] ss:$20 sps:$4 sm:$0xff]   ;;  %v873_v37 = vld [vmem:[#allocation2 + $0x34] ss:$20 sps:$4 sm:$0xff]   ;;  %v878_v52 = vld [vmem:[#allocation2 + $0xfc] ss:$20 sps:$4 sm:$0xff]  }
  0x1d   :  { %747 = vmatpush3.bf16.msra.mxu0 %v849_v3  ;;  %767 = vmatpush3.bf16.msra.mxu1 %v858_v8  ;;  %v876_v40 = vld [vmem:[#allocation2 + $0xac] ss:$20 sps:$4 sm:$0xff]   ;;  %v877_v41 = vld [vmem:[#allocation2 + $0xd4] ss:$20 sps:$4 sm:$0xff]   ;;  %v879_v53 = vld [vmem:[#allocation2 + $0x124] ss:$20 sps:$4 sm:$0xff]  }
  0x1e   :  { %748 = vmatprep.subr.bf16.mxu0 %v923_v0  ;;  %768 = vmatprep.subr.bf16.mxu1 %v923_v0  ;;  %v652_v42 = vld [vmem:[%s1030_s2 + $0x1] ss:$0 sm:$0xff]  ;;  %v880_v54 = vld [vmem:[#allocation2 + $0x10] ss:$20 sps:$4 sm:$0xff]   ;;  %v881_v55 = vld [vmem:[#allocation2 + $0x38] ss:$20 sps:$4 sm:$0xff]  }
  0x1f   :  { %v882_v56 = vld [vmem:[#allocation2 + $0x60] ss:$20 sps:$4 sm:$0xff]   ;;  %v883_v57 = vld [vmem:[#allocation2 + $0x88] ss:$20 sps:$4 sm:$0xff]   ;;  %v884_v58 = vld [vmem:[#allocation2 + $0xb0] ss:$20 sps:$4 sm:$0xff]  }
  0x20   :  { %v885_v59 = vld [vmem:[#allocation2 + $0xd8] ss:$20 sps:$4 sm:$0xff]   ;;  %v661_v60 = vld [vmem:[%s1030_s2 + $0x2] ss:$0 sm:$0xff]  ;;  %v887_v8 = vld [vmem:[#allocation2 + $0x128] ss:$20 sps:$4 sm:$0xff]  }
  0x21   :  { %749 = vmatpush3.bf16.msra.mxu0 %v850_v5  ;;  %769 = vmatpush3.bf16.msra.mxu1 %v859_v10 }
  0x22   :  { %750 = vmatprep.subr.bf16.mxu0 %v923_v0  ;;  %770 = vmatprep.subr.bf16.mxu1 %v923_v0 }
  0x25   :  { %751 = vmatpush3.bf16.msra.mxu0 %v851_v7  ;;  %771 = vmatpush3.bf16.msra.mxu1 %v860_v12  ;;  %v886_v7 = vld [vmem:[#allocation2 + $0x100] ss:$20 sps:$4 sm:$0xff]  }
  0x26   :  { %752 = vmatprep.subr.bf16.mxu0 %v923_v0  ;;  %772 = vmatprep.subr.bf16.mxu1 %v923_v0 }
  0x29   :  { %753 = vmatpush3.bf16.msra.mxu0 %v852_v9  ;;  %773 = vmatpush3.bf16.msra.mxu1 %v861_v14  ;;  %v670_v9 = vld [vmem:[%s1030_s2 + $0x3] ss:$0 sm:$0xff] }
  0x2a   :  { %754 = vmatprep.subr.bf16.mxu0 %v923_v0  ;;  %774 = vmatprep.subr.bf16.mxu1 %v923_v0 }
  0x2d   :  { %755 = vmatpush3.bf16.msra.mxu0 %v853_v11  ;;  %775 = vmatpush3.bf16.msra.mxu1 %v862_v16 }
  0x2e   :  { %756 = vmatprep.subr.bf16.mxu0 %v923_v0  ;;  %776 = vmatprep.subr.bf16.mxu1 %v923_v0 }
  0x31   :  { %757 = vmatpush3.bf16.msra.mxu0 %v854_v13  ;;  %777 = vmatpush3.bf16.msra.mxu1 %v863_v17 }
  0x32   :  { %782 = vmatprep.subr.bf16.mxu0 %v923_v0  ;;  %802 = vmatprep.subr.bf16.mxu1 %v923_v0 }
  0x34   :  { %759 = vmatmul.mubr.bf16.vlgmr.msra.gmra.mrb[0].mxu0 %v855_v15 }
  0x35   :  { %798 = vmatprep.mubr.msk.bf16.mxu0 %vm924_vm0, %v923_v0  ;;  %783 = vmatpush3.bf16.msra.mxu0 %v864_v18 }
  0x36   :  { %784 = vmatprep.subr.bf16.mxu0 %v923_v0 }
  0x39   :  { %785 = vmatpush3.bf16.msra.mxu0 %v865_v19 }
  0x3a   :  { %786 = vmatprep.subr.bf16.mxu0 %v923_v0 }
  0x3d   :  { %787 = vmatpush3.bf16.msra.mxu0 %v866_v20 }
  0x3e   :  { %788 = vmatprep.subr.bf16.mxu0 %v923_v0 }
  0x41   :  { %789 = vmatpush3.bf16.msra.mxu0 %v867_v21 }
  0x42   :  { %790 = vmatprep.subr.bf16.mxu0 %v923_v0 }
  0x45   :  { %791 = vmatpush3.bf16.msra.mxu0 %v868_v22 }
  0x46   :  { %792 = vmatprep.subr.bf16.mxu0 %v923_v0 }
  0x49   :  { %793 = vmatpush3.bf16.msra.mxu0 %v869_v23 }
  0x4a   :  { %794 = vmatprep.subr.bf16.mxu0 %v923_v0 }
  0x4d   :  { %795 = vmatpush3.bf16.msra.mxu0 %v870_v34 }
  0x4e   :  { %796 = vmatprep.subr.bf16.mxu0 %v923_v0 }
  0x51   :  { %797 = vmatpush3.bf16.msra.mxu0 %v871_v35 }
  0x52   :  { %822 = vmatprep.subr.bf16.mxu0 %v923_v0 }
 0x107   :  { %v142_v25 = vpop.f32.mrb[0].mxu0 }
 0x108   :  { %v143_v26 = vadd.f32 %v642_v24, %v142_v25  ;;  %v760_v27 = vpop.f32.mrb[1].mxu0 }
 0x109   :  { %v145_v28 = vpop.f32.mrb[2].mxu0 }
 0x10a   :  { %v146_v29 = vadd.f32 %v642_v24, %v145_v28  ;;  %v761_v30 = vpop.f32.mrb[3].mxu0  ;;  %v149_v31 = vmax.f32 %v143_v26, 0.0 }
 0x10c   :  { %v150_v32 = vmax.f32 %v146_v29, 0.0 }
 0x10e   :  { %v151_v33 = vpack.c.bf16 %v150_v32, %v149_v31 }
 0x110   :  { %779 = vmatmul.mubr.bf16.vlgmr.msra.gmra.mrb[0].mxu1 %v151_v33 }
 0x111   :  { %818 = vmatprep.mubr.msk.bf16.mxu1 %vm924_vm0, %v923_v0  ;;  %803 = vmatpush3.bf16.msra.mxu1 %v872_v36 }
 0x112   :  { %804 = vmatprep.subr.bf16.mxu1 %v923_v0 }
 0x115   :  { %805 = vmatpush3.bf16.msra.mxu1 %v873_v37 }
 0x116   :  { %806 = vmatprep.subr.bf16.mxu1 %v923_v0 }
 0x119   :  { %807 = vmatpush3.bf16.msra.mxu1 %v874_v38 }
 0x11a   :  { %808 = vmatprep.subr.bf16.mxu1 %v923_v0 }
 0x11d   :  { %809 = vmatpush3.bf16.msra.mxu1 %v875_v39 }
 0x11e   :  { %810 = vmatprep.subr.bf16.mxu1 %v923_v0 }
 0x121   :  { %811 = vmatpush3.bf16.msra.mxu1 %v876_v40 }
 0x122   :  { %812 = vmatprep.subr.bf16.mxu1 %v923_v0 }
 0x125   :  { %813 = vmatpush3.bf16.msra.mxu1 %v877_v41 }
 0x126   :  { %814 = vmatprep.subr.bf16.mxu1 %v923_v0 }
 0x129   :  { %815 = vmatpush3.bf16.msra.mxu1 %v878_v52 }
 0x12a   :  { %816 = vmatprep.subr.bf16.mxu1 %v923_v0 }
 0x12d   :  { %817 = vmatpush3.bf16.msra.mxu1 %v879_v53 }
 0x1e3   :  { %v257_v43 = vpop.f32.mrb[0].mxu1 }
 0x1e4   :  { %v258_v44 = vadd.f32 %v652_v42, %v257_v43  ;;  %v780_v45 = vpop.f32.mrb[1].mxu1 }
 0x1e5   :  { %v260_v46 = vpop.f32.mrb[2].mxu1 }
 0x1e6   :  { %v261_v47 = vadd.f32 %v652_v42, %v260_v46  ;;  %v781_v48 = vpop.f32.mrb[3].mxu1  ;;  %v264_v49 = vmax.f32 %v258_v44, 0.0 }
 0x1e8   :  { %v265_v50 = vmax.f32 %v261_v47, 0.0 }
 0x1ea   :  { %v266_v51 = vpack.c.bf16 %v265_v50, %v264_v49 }
 0x1ec   :  { %799 = vmatmul.mubr.bf16.vlgmr.msra.gmra.mrb[4].mxu0 %v266_v51 }
 0x1ed   :  { %838 = vmatprep.mubr.msk.bf16.mxu0 %vm924_vm0, %v923_v0  ;;  %823 = vmatpush3.bf16.msra.mxu0 %v880_v54 }
 0x1ee   :  { %824 = vmatprep.subr.bf16.mxu0 %v923_v0 }
 0x1f1   :  { %825 = vmatpush3.bf16.msra.mxu0 %v881_v55 }
 0x1f2   :  { %826 = vmatprep.subr.bf16.mxu0 %v923_v0 }
 0x1f5   :  { %827 = vmatpush3.bf16.msra.mxu0 %v882_v56 }
 0x1f6   :  { %828 = vmatprep.subr.bf16.mxu0 %v923_v0 }
 0x1f9   :  { %829 = vmatpush3.bf16.msra.mxu0 %v883_v57 }
 0x1fa   :  { %830 = vmatprep.subr.bf16.mxu0 %v923_v0 }
 0x1fd   :  { %831 = vmatpush3.bf16.msra.mxu0 %v884_v58 }
 0x1fe   :  { %832 = vmatprep.subr.bf16.mxu0 %v923_v0 }
 0x201   :  { %833 = vmatpush3.bf16.msra.mxu0 %v885_v59 }
 0x202   :  { %834 = vmatprep.subr.bf16.mxu0 %v923_v0 }
 0x205   :  { %835 = vmatpush3.bf16.msra.mxu0 %v886_v7 }
 0x206   :  { %836 = vmatprep.subr.bf16.mxu0 %v923_v0  ;;  %v679_v0 = vld [vmem:[%s1030_s2 + $0x4] ss:$0 sm:$0xff] }
 0x209   :  { %837 = vmatpush3.bf16.msra.mxu0 %v887_v8 }
 0x2bf   :  { %v372_v61 = vpop.f32.mrb[4].mxu0 }
 0x2c0   :  { %v373_v62 = vadd.f32 %v661_v60, %v372_v61  ;;  %v800_v63 = vpop.f32.mrb[5].mxu0 }
 0x2c1   :  { %v375_v1 = vpop.f32.mrb[6].mxu0 }
 0x2c2   :  { %v376_v2 = vadd.f32 %v661_v60, %v375_v1  ;;  %v801_v3 = vpop.f32.mrb[7].mxu0  ;;  %v379_v4 = vmax.f32 %v373_v62, 0.0 }
 0x2c4   :  { %v380_v5 = vmax.f32 %v376_v2, 0.0 }
 0x2c6   :  { %v381_v6 = vpack.c.bf16 %v380_v5, %v379_v4 }
 0x2c8   :  { %819 = vmatmul.mubr.bf16.vlgmr.msra.gmra.mrb[4].mxu1 %v381_v6 }
 0x39b   :  { %v487_v10 = vpop.f32.mrb[4].mxu1 }
 0x39c   :  { %v488_v11 = vadd.f32 %v670_v9, %v487_v10  ;;  %v820_v12 = vpop.f32.mrb[5].mxu1 }
 0x39d   :  { %v490_v13 = vpop.f32.mrb[6].mxu1 }
 0x39e   :  { %v491_v14 = vadd.f32 %v670_v9, %v490_v13  ;;  %v821_v15 = vpop.f32.mrb[7].mxu1  ;;  %v494_v16 = vmax.f32 %v488_v11, 0.0 }
 0x3a0   :  { %v495_v17 = vmax.f32 %v491_v14, 0.0 }
 0x3a2   :  { %v496_v18 = vpack.c.bf16 %v495_v17, %v494_v16 }
 0x3a4   :  { %839 = vmatmul.mubr.bf16.vlgmr.msra.gmra.mrb[8].mxu0 %v496_v18 }
 0x477   :  { %v602_v19 = vpop.f32.mrb[8].mxu0 }
 0x478   :  { %v603_v20 = vadd.f32 %v679_v0, %v602_v19  ;;  %v840_v21 = vpop.f32.mrb[9].mxu0 }
 0x479   :  { %v605_v22 = vpop.f32.mrb[10].mxu0 }
 0x47a   :  { %609 = vmax.xlane.f32.xlu0 %v603_v20  ;;  %v841_v23 = vpop.f32.mrb[11].mxu0  ;;  %v606_v24 = vadd.f32 %v679_v0, %v605_v22 }
 0x47e   :  { %611 = vmax.xlane.f32.xlu0 %v606_v24 }
 0x507   :  { %v610_v25 = vpop.xlane.xlu0 %609 }
 0x508   :  { %v613_v26 = vsub.f32 %v603_v20, %v610_v25 }
 0x50a   :  { %v615_v27 = vmul.f32 1.442695, %v613_v26 }
 0x50b   :  { %v612_v28 = vpop.xlane.xlu0 %611 }
 0x50c   :  { %888 = vpow2.f32 %v615_v27  ;;  %v614_v29 = vsub.f32 %v606_v24, %v612_v28 }
 0x50e   :  { %v617_v30 = vmul.f32 1.442695, %v614_v29 }
 0x510   :  { %890 = vpow2.f32 %v617_v30 }
 0x516   :  { %v889_v31 = vpop.eup %888 }
 0x517   :  { %619 = vadd.xlane.f32.xlu1 %v889_v31 }
 0x51a   :  { %v891_v32 = vpop.eup %890 }
 0x51b   :  { %621 = vadd.xlane.f32.xlu1 %v891_v32 }
 0x5a4   :  { %v620_v33 = vpop.xlane.xlu1 %619 }
 0x5a5   :  { %892 = vrcp.f32 %v620_v33 }
 0x5a8   :  { %v622_v34 = vpop.xlane.xlu1 %621 }
 0x5a9   :  { %894 = vrcp.f32 %v622_v34 }
 0x5af   :  { %v893_v35 = vpop.eup %892 }
 0x5b0   :  { %v625_v37 = vmul.f32 %v893_v35, %v889_v31 }
 0x5b3   :  { %v895_v36 = vpop.eup %894 }
 0x5b4   :  { %v626_v38 = vmul.f32 %v895_v36, %v891_v32 }
 0x5b6   :  { %v695_v39 = vpack.c.bf16 %v626_v38, %v625_v37 }
 0x5b8   :  { %696 = vst [vmem:[%s1031_s3] sm:$0xff] %v695_v39  }
 0x5b9   :  { %641 = vsyncpa [#allocation3], 1 }

</bundles_post_ra>
